<compile_context>
chip_gen: v5e
topology: v5e:2x2
jax: 0.10.0
libtpu: 0.0.40
codegen_flags: <defaults>
</compile_context>

<pallas_src>
import jax
import jax.numpy as jnp
from jax.experimental import pallas as pl
from jax.experimental.pallas import tpu as pltpu


def _pad_to(n, m):
    return -(-n // m) * m


# --------------------------------------------------------------------------- #
# Parameter packing: fold / permute / pad everything into
#   * one bf16 (R, 128) weight slab (single HBM->VMEM DMA, VMEM-resident), and
#   * one small f32 (8, 128) bias slab.
# --------------------------------------------------------------------------- #
def pack_params(params, input_dim, hidden_dim, output_dim):
    assert hidden_dim == output_dim, "reference forward requires hidden_dim == output_dim"
    H = hidden_dim
    f32 = jnp.float32

    # fused output lane layout: [emb 0:H | task | conf | act | zeros]
    task0, task1 = H, H + 10
    conf0, conf1 = H + 10, H + 11
    act0, act1 = H + 11, H + 61
    assert act1 <= 128, "fused head layout needs hidden_dim <= 67"

    def igo(m):  # keep PyTorch gate columns (i, g, o); drop the dead forget gate
        return jnp.concatenate(
            [m[..., 0:H], m[..., 2 * H:3 * H], m[..., 3 * H:4 * H]], axis=-1)

    A = lambda v: jnp.asarray(v, f32)

    # ---- pack-time folds (exact in exact arithmetic) -------------------------
    # LayerNorm affine folded into w3 / b3.
    w3f = A(params["ln_g"]).reshape(-1, 1) * A(params["w3"])
    b3f = A(params["b3"]) + A(params["ln_b"]).reshape(1, -1) @ A(params["w3"])

    # Decision-net output layer (w4, b4) folded into the layer-0 LSTM gate matmul.
    wih0_igo = igo(A(params["wih0"]))                              # (H, 3H)
    wih0f = A(params["w4"]) @ wih0_igo                             # (H//2, 3H)
    blstm0f = A(params["b4"]) @ wih0_igo + igo(A(params["bih0"]) + A(params["bhh0"]))
    wih1_igo = igo(A(params["wih1"]))                              # (H, 3H)
    blstm1f = igo(A(params["bih1"]) + A(params["bhh1"]))

    # Fused heads; emb columns (0:H) stay zero — embeddings are added in f32 in-kernel.
    w_heads = jnp.zeros((H, 128), f32)
    w_heads = w_heads.at[:, task0:task1].set(A(params["wt"]))
    w_heads = w_heads.at[:, conf0:conf1].set(A(params["wc"]))
    w_heads = w_heads.at[:, act0:act1].set(A(params["wa"]))
    b_heads = jnp.zeros((1, 128), f32)
    b_heads = b_heads.at[:, task0:task1].set(A(params["bt"]).reshape(1, -1))
    b_heads = b_heads.at[:, conf0:conf1].set(A(params["bc"]).reshape(1, -1))
    b_heads = b_heads.at[:, act0:act1].set(A(params["ba"]).reshape(1, -1))

    # ---- bf16 weight slab (rows padded to the bf16 sublane tile of 16) -------
    mats = [
        ("w1", A(params["w1"])),      # (in, H)
        ("w2", A(params["w2"])),      # (H, H)
        ("w3f", w3f),                 # (H, H//2)
        ("wih0f", wih0f),             # (H//2, 3H) -> gate lanes zero-padded to 128
        ("wih1", wih1_igo),           # (H, 3H)    -> gate lanes zero-padded to 128
        ("wheads", w_heads),          # (H, 128)
    ]
    gate_mats = {"wih0f", "wih1"}     # read all 128 lanes (zero padded) -> lane-aligned gates
    segs, mat_off, mat_shape = [], {}, {}
    row = 0
    for name, m in mats:
        r, c = m.shape
        rp = _pad_to(r, 16)
        segs.append(jnp.zeros((rp, 128), f32).at[:r, :c].set(m))
        mat_off[name] = row
        mat_shape[name] = (r, 128 if (name in gate_mats or c == 128) else c)
        row += rp
    w_slab = jnp.concatenate(segs, axis=0).astype(jnp.bfloat16)

    # ---- f32 bias slab --------------------------------------------------------
    biases = [
        ("b1", A(params["b1"]).reshape(-1), H),
        ("b2", A(params["b2"]).reshape(-1), H),
        ("b3f", b3f.reshape(-1), H // 2),
        ("blstm0f", blstm0f.reshape(-1), 128),   # gate lanes, zero padded
        ("blstm1f", blstm1f.reshape(-1), 128),
        ("bheads", b_heads.reshape(-1), 128),
    ]
    b_slab = jnp.zeros((_pad_to(len(biases), 8), 128), f32)
    bias_row = {}
    for k, (name, b, width) in enumerate(biases):
        b_slab = b_slab.at[k, :b.shape[0]].set(b)
        bias_row[name] = (k, width)

    meta = dict(mat_off=mat_off, mat_shape=mat_shape, bias_row=bias_row,
                hidden_dim=H, input_dim=input_dim, output_dim=output_dim,
                task0=task0, task1=task1, conf0=conf0, conf1=conf1,
                act0=act0, act1=act1)
    return w_slab, b_slab, meta


# --------------------------------------------------------------------------- #
# Kernel: encoder MLP + LayerNorm -> decision MLP -> 2-layer LSTM (1 step,
# zero initial state) -> fused heads.  One batch tile per grid step; the two
# parameter slabs are VMEM-resident across the whole grid.
# --------------------------------------------------------------------------- #
def make_jarvis_kernel(meta):
    H = meta["hidden_dim"]
    conf_lane = meta["conf0"]
    mat_off, mat_shape, bias_row = meta["mat_off"], meta["mat_shape"], meta["bias_row"]

    def kernel(x_ref, w_ref, b_ref, out_ref):
        f32, bf16 = jnp.float32, jnp.bfloat16

        def Wm(name):                       # static slice of the bf16 weight slab
            off = mat_off[name]
            r, c = mat_shape[name]
            return w_ref[off:off + r, 0:c]

        def Bv(name):                       # static 1-row slice of the f32 bias slab
            row, c = bias_row[name]
            return b_ref[row:row + 1, 0:c]

        def mm(a, name):                    # bf16 MXU matmul, f32 accumulation
            return jnp.dot(a.astype(bf16), Wm(name), preferred_element_type=f32)

        x = x_ref[...]                      # (tm, input_dim) f32

        # encoder: Linear -> ReLU -> Dropout(id) -> Linear -> ReLU -> LayerNorm
        h = jnp.maximum(mm(x, "w1") + Bv("b1"), 0.0)
        h = jnp.maximum(mm(h, "w2") + Bv("b2"), 0.0)
        # LN affine is folded into w3/b3; mean & mean-of-squares reduce in parallel.
        mu = jnp.mean(h, axis=-1, keepdims=True)
        ms = jnp.mean(h * h, axis=-1, keepdims=True)
        hn = (h - mu) * jax.lax.rsqrt(ms - mu * mu + 1e-5)

        # decision network layer 1 (layer 2 / w4,b4 folded into the LSTM gate matmul)
        d = jnp.maximum(mm(hn, "w3f") + Bv("b3f"), 0.0)

        # 2-layer LSTM, single timestep, zero initial (h, c): W_hh and the forget
        # gate vanish (dropped at pack time); gate lanes are [i | g | o | 0-pad].
        def lstm_cell(inp, wname, bname):
            g = mm(inp, wname) + Bv(bname)          # (tm, 128)
            sg = jax.nn.sigmoid(g)                  # whole-vreg EUP activations
            th = jnp.tanh(g)
            i, gg, o = sg[:, 0:H], th[:, H:2 * H], sg[:, 2 * H:3 * H]
            return o * jnp.tanh(i * gg)             # (tm, H)

        h1 = lstm_cell(d, "wih0f", "blstm0f")       # layer 0 (inter-layer dropout = id)
        h2 = lstm_cell(h1, "wih1", "blstm1f")       # layer 1

        # fused heads: one lane-dense (tm, 128) MXU dot; emb lanes (0:H) of the dot
        # are exactly zero, so the f32 LSTM output is merged by a zero-pad + add.
        out = mm(h2, "wheads") + Bv("bheads")
        lane = jax.lax.broadcasted_iota(jnp.int32, out.shape, 1)
        out = jnp.where(lane == conf_lane, jax.nn.sigmoid(out), out)   # confidence lane
        emb = jnp.concatenate(
            [h2, jnp.zeros((h2.shape[0], 128 - H), f32)], axis=-1)
        out_ref[...] = out + emb                    # single unmasked 128-wide store

    return kernel


def jarvis_brain_forward(x, w_slab, b_slab, meta, block_m=128):
    """x: (B, input_dim) or (input_dim,) float32.  Returns dict like the PyTorch module.

    block_m: rows per grid step.  On v6e/v7x prefer >=256 for large batches
    (256-wide MXU); >=128 on v5e.  Any multiple of 8 works."""
    H = meta["hidden_dim"]
    x = jnp.asarray(x, jnp.float32)
    squeeze = x.ndim == 1
    if squeeze:
        x = x[None, :]
    B, in_dim = x.shape
    assert in_dim == meta["input_dim"]

    tm = int(min(block_m, _pad_to(B, 8)))
    tm = max(8, (tm // 8) * 8)
    Bp = _pad_to(B, tm)
    if Bp != B:
        x = jnp.pad(x, ((0, Bp - B), (0, 0)))

    out = pl.pallas_call(
        make_jarvis_kernel(meta),
        out_shape=jax.ShapeDtypeStruct((Bp, 128), jnp.float32),
        grid=(Bp // tm,),
        in_specs=[
            pl.BlockSpec((tm, in_dim), lambda i: (i, 0)),     # batch tile, pipelined
            pl.BlockSpec(w_slab.shape, lambda i: (0, 0)),     # bf16 weights, DMA'd once
            pl.BlockSpec(b_slab.shape, lambda i: (0, 0)),     # f32 biases, DMA'd once
        ],
        out_specs=pl.BlockSpec((tm, 128), lambda i: (i, 0)),
        compiler_params=pltpu.CompilerParams(
            dimension_semantics=("parallel",)),               # shard batch across TCs (v7x)
    )(x, w_slab, b_slab)

    out = out[:B]
    res = {
        "task_logits": out[:, meta["task0"]:meta["task1"]],
        "confidence": out[:, meta["conf0"]:meta["conf1"]],
        "action_logits": out[:, meta["act0"]:meta["act1"]],
        "embeddings": out[:, 0:H],
    }
    if squeeze:
        res = {k: v[0] for k, v in res.items()}
    return res


# --------------------------------------------------------------------------- #
# Deterministic synthetic parameter init (PyTorch-style uniform fan-in bounds)
# and a pure-JAX f32 reference of the original forward (context=None path).
# --------------------------------------------------------------------------- #
def init_params(key, input_dim, hidden_dim, output_dim):
    keys = iter(jax.random.split(key, 32))

    def linear(fan_in, fan_out):
        bound = 1.0 / float(fan_in) ** 0.5
        w = jax.random.uniform(next(keys), (fan_in, fan_out), jnp.float32, -bound, bound)
        b = jax.random.uniform(next(keys), (1, fan_out), jnp.float32, -bound, bound)
        return w, b

    p = {}
    p["w1"], p["b1"] = linear(input_dim, hidden_dim)
    p["w2"], p["b2"] = linear(hidden_dim, hidden_dim)
    # non-trivial LN affine so the pack-time fold is actually exercised
    p["ln_g"] = jax.random.uniform(next(keys), (1, hidden_dim), jnp.float32, 0.5, 1.5)
    p["ln_b"] = jax.random.uniform(next(keys), (1, hidden_dim), jnp.float32, -0.1, 0.1)
    p["w3"], p["b3"] = linear(hidden_dim, hidden_dim // 2)
    p["w4"], p["b4"] = linear(hidden_dim // 2, output_dim)

    bound = 1.0 / float(hidden_dim) ** 0.5

    def lstm_layer(in_dim):
        wih = jax.random.uniform(next(keys), (in_dim, 4 * hidden_dim), jnp.float32, -bound, bound)
        bih = jax.random.uniform(next(keys), (1, 4 * hidden_dim), jnp.float32, -bound, bound)
        bhh = jax.random.uniform(next(keys), (1, 4 * hidden_dim), jnp.float32, -bound, bound)
        return wih, bih, bhh

    p["wih0"], p["bih0"], p["bhh0"] = lstm_layer(output_dim)
    p["wih1"], p["bih1"], p["bhh1"] = lstm_layer(hidden_dim)
    p["wt"], p["bt"] = linear(output_dim, 10)
    p["wc"], p["bc"] = linear(output_dim, 1)
    p["wa"], p["ba"] = linear(output_dim, 50)
    return p


def jarvis_reference(params, x, hidden_dim):
    H = hidden_dim
    h = jnp.maximum(x @ params["w1"] + params["b1"], 0.0)
    h = jnp.maximum(h @ params["w2"] + params["b2"], 0.0)
    mu = jnp.mean(h, axis=-1, keepdims=True)
    var = jnp.mean((h - mu) ** 2, axis=-1, keepdims=True)        # biased, as in nn.LayerNorm
    h = (h - mu) / jnp.sqrt(var + 1e-5) * params["ln_g"] + params["ln_b"]
    d = jnp.maximum(h @ params["w3"] + params["b3"], 0.0)
    d = d @ params["w4"] + params["b4"]

    def cell(inp, wih, bih, bhh):                                 # one step, zero (h, c)
        g = inp @ wih + bih + bhh                                 # PyTorch gate order i,f,g,o
        i = jax.nn.sigmoid(g[:, 0:H])
        gg = jnp.tanh(g[:, 2 * H:3 * H])
        o = jax.nn.sigmoid(g[:, 3 * H:4 * H])
        return o * jnp.tanh(i * gg)

    h1 = cell(d, params["wih0"], params["bih0"], params["bhh0"])
    h2 = cell(h1, params["wih1"], params["bih1"], params["bhh1"])
    return {
        "task_logits": h2 @ params["wt"] + params["bt"],
        "confidence": jax.nn.sigmoid(h2 @ params["wc"] + params["bc"]),
        "action_logits": h2 @ params["wa"] + params["ba"],
        "embeddings": h2,
    }


if __name__ == "__main__":
    # Small shapes; hidden_dim == output_dim is required for the reference
    # module's forward to be shape-consistent (LSTM output feeds the heads).
    INPUT_DIM, HIDDEN_DIM, OUTPUT_DIM = 64, 32, 32
    BATCH = 16

    key = jax.random.PRNGKey(0)
    k_params, k_x = jax.random.split(key)
    params = init_params(k_params, INPUT_DIM, HIDDEN_DIM, OUTPUT_DIM)
    w_slab, b_slab, meta = pack_params(params, INPUT_DIM, HIDDEN_DIM, OUTPUT_DIM)
    x = jax.random.normal(k_x, (BATCH, INPUT_DIM), jnp.float32)

    # block_m=8 -> grid=(2,) to exercise the batched pipeline at small shapes.
    out = jarvis_brain_forward(x, w_slab, b_slab, meta, block_m=8)
    jax.block_until_ready(out)

    assert out["task_logits"].shape == (BATCH, 10)
    assert out["confidence"].shape == (BATCH, 1)
    assert out["action_logits"].shape == (BATCH, 50)
    assert out["embeddings"].shape == (BATCH, HIDDEN_DIM)

    # Numerical sanity vs. a pure-JAX f32 reference (bf16 weights -> loose tol).
    ref = jarvis_reference(params, x, HIDDEN_DIM)
    for name in ("task_logits", "confidence", "action_logits", "embeddings"):
        err = float(jnp.max(jnp.abs(out[name] - ref[name])))
        assert err < 5e-2, f"{name}: max |err| = {err}"

    print("KERNEL_OK")
</pallas_src>

<mosaic_0001>
module attributes {stable_mosaic.version = 11 : i64} {
  func.func @kernel(%arg0: i32, %arg1: memref<8x64xf32, #tpu.memory_space<vmem>>, %arg2: memref<208x128xbf16, #tpu.memory_space<vmem>>, %arg3: memref<8x128xf32, #tpu.memory_space<vmem>>, %arg4: memref<8x128xf32, #tpu.memory_space<vmem>>) attributes {dimension_semantics = [#tpu.dimension_semantics<parallel>], iteration_bounds = array<i64: 2>, scalar_prefetch = 0 : i64, scratch_operands = 0 : i64, tpu.core_type = #tpu.core_type<tc>, window_params = [{transform_indices = @transform_0, window_bounds = array<i64: 8, 64>}, {pipeline_mode = #tpu.pipeline_mode<synchronous>, transform_indices = @transform_1, window_bounds = array<i64: 208, 128>}, {pipeline_mode = #tpu.pipeline_mode<synchronous>, transform_indices = @transform_2, window_bounds = array<i64: 8, 128>}, {transform_indices = @transform_3, window_bounds = array<i64: 8, 128>}]} {
    %c0 = arith.constant 0 : index
    %c0_0 = arith.constant 0 : index
    %0 = vector.load %arg1[%c0, %c0_0] : memref<8x64xf32, #tpu.memory_space<vmem>>, vector<8x64xf32>
    %1 = arith.truncf %0 : vector<8x64xf32> to vector<8x64xbf16>
    %c0_1 = arith.constant 0 : index
    %c0_2 = arith.constant 0 : index
    %2 = vector.load %arg2[%c0_1, %c0_2] : memref<208x128xbf16, #tpu.memory_space<vmem>>, vector<64x32xbf16>
    %cst = arith.constant dense<0.000000e+00> : vector<8x32xf32>
    %3 = tpu.matmul %1, %2, %cst {dimension_numbers = #tpu.dot_dimension_numbers<[1], [0], [0], [1], [0, 0, 1, 1], [], []>} : vector<8x64xbf16>, vector<64x32xbf16>, vector<8x32xf32> -> vector<8x32xf32>
    %c0_3 = arith.constant 0 : index
    %c0_4 = arith.constant 0 : index
    %4 = vector.load %arg3[%c0_3, %c0_4] : memref<8x128xf32, #tpu.memory_space<vmem>>, vector<1x32xf32>
    %5 = vector.broadcast %4 : vector<1x32xf32> to vector<8x32xf32>
    %6 = arith.addf %3, %5 : vector<8x32xf32>
    %cst_5 = arith.constant 0.000000e+00 : f32
    %7 = vector.broadcast %cst_5 : f32 to vector<8x32xf32>
    %8 = arith.maximumf %6, %7 : vector<8x32xf32>
    %9 = arith.truncf %8 : vector<8x32xf32> to vector<8x32xbf16>
    %c64 = arith.constant 64 : index
    %c0_6 = arith.constant 0 : index
    %10 = vector.load %arg2[%c64, %c0_6] : memref<208x128xbf16, #tpu.memory_space<vmem>>, vector<32x32xbf16>
    %cst_7 = arith.constant dense<0.000000e+00> : vector<8x32xf32>
    %11 = tpu.matmul %9, %10, %cst_7 {dimension_numbers = #tpu.dot_dimension_numbers<[1], [0], [0], [1], [0, 0, 1, 1], [], []>} : vector<8x32xbf16>, vector<32x32xbf16>, vector<8x32xf32> -> vector<8x32xf32>
    %c1 = arith.constant 1 : index
    %c0_8 = arith.constant 0 : index
    %12 = vector.load %arg3[%c1, %c0_8] : memref<8x128xf32, #tpu.memory_space<vmem>>, vector<1x32xf32>
    %13 = vector.broadcast %12 : vector<1x32xf32> to vector<8x32xf32>
    %14 = arith.addf %11, %13 : vector<8x32xf32>
    %cst_9 = arith.constant 0.000000e+00 : f32
    %15 = vector.broadcast %cst_9 : f32 to vector<8x32xf32>
    %16 = arith.maximumf %14, %15 : vector<8x32xf32>
    %cst_10 = arith.constant dense<0.000000e+00> : vector<8xf32>
    %17 = vector.multi_reduction <add>, %16, %cst_10 [1] : vector<8x32xf32> to vector<8xf32>
    %18 = vector.shape_cast %17 : vector<8xf32> to vector<8x1xf32>
    %cst_11 = arith.constant 3.200000e+01 : f32
    %19 = vector.broadcast %cst_11 : f32 to vector<8x1xf32>
    %20 = arith.divf %18, %19 : vector<8x1xf32>
    %21 = arith.mulf %16, %16 : vector<8x32xf32>
    %cst_12 = arith.constant dense<0.000000e+00> : vector<8xf32>
    %22 = vector.multi_reduction <add>, %21, %cst_12 [1] : vector<8x32xf32> to vector<8xf32>
    %23 = vector.shape_cast %22 : vector<8xf32> to vector<8x1xf32>
    %cst_13 = arith.constant 3.200000e+01 : f32
    %24 = vector.broadcast %cst_13 : f32 to vector<8x1xf32>
    %25 = arith.divf %23, %24 : vector<8x1xf32>
    %26 = vector.broadcast %20 : vector<8x1xf32> to vector<8x32xf32>
    %27 = arith.subf %16, %26 : vector<8x32xf32>
    %28 = arith.mulf %20, %20 : vector<8x1xf32>
    %29 = arith.subf %25, %28 : vector<8x1xf32>
    %cst_14 = arith.constant 9.99999974E-6 : f32
    %30 = vector.broadcast %cst_14 : f32 to vector<8x1xf32>
    %31 = arith.addf %29, %30 : vector<8x1xf32>
    %32 = math.rsqrt %31 : vector<8x1xf32>
    %33 = vector.broadcast %32 : vector<8x1xf32> to vector<8x32xf32>
    %34 = arith.mulf %27, %33 : vector<8x32xf32>
    %35 = arith.truncf %34 : vector<8x32xf32> to vector<8x32xbf16>
    %c96 = arith.constant 96 : index
    %c0_15 = arith.constant 0 : index
    %36 = vector.load %arg2[%c96, %c0_15] : memref<208x128xbf16, #tpu.memory_space<vmem>>, vector<32x16xbf16>
    %cst_16 = arith.constant dense<0.000000e+00> : vector<8x16xf32>
    %37 = tpu.matmul %35, %36, %cst_16 {dimension_numbers = #tpu.dot_dimension_numbers<[1], [0], [0], [1], [0, 0, 1, 1], [], []>} : vector<8x32xbf16>, vector<32x16xbf16>, vector<8x16xf32> -> vector<8x16xf32>
    %c2 = arith.constant 2 : index
    %c0_17 = arith.constant 0 : index
    %38 = vector.load %arg3[%c2, %c0_17] : memref<8x128xf32, #tpu.memory_space<vmem>>, vector<1x16xf32>
    %39 = vector.broadcast %38 : vector<1x16xf32> to vector<8x16xf32>
    %40 = arith.addf %37, %39 : vector<8x16xf32>
    %cst_18 = arith.constant 0.000000e+00 : f32
    %41 = vector.broadcast %cst_18 : f32 to vector<8x16xf32>
    %42 = arith.maximumf %40, %41 : vector<8x16xf32>
    %43 = arith.truncf %42 : vector<8x16xf32> to vector<8x16xbf16>
    %c128 = arith.constant 128 : index
    %c0_19 = arith.constant 0 : index
    %44 = vector.load %arg2[%c128, %c0_19] : memref<208x128xbf16, #tpu.memory_space<vmem>>, vector<16x128xbf16>
    %cst_20 = arith.constant dense<0.000000e+00> : vector<8x128xf32>
    %45 = tpu.matmul %43, %44, %cst_20 {dimension_numbers = #tpu.dot_dimension_numbers<[1], [0], [0], [1], [0, 0, 1, 1], [], []>} : vector<8x16xbf16>, vector<16x128xbf16>, vector<8x128xf32> -> vector<8x128xf32>
    %c3 = arith.constant 3 : index
    %c0_21 = arith.constant 0 : index
    %46 = vector.load %arg3[%c3, %c0_21] : memref<8x128xf32, #tpu.memory_space<vmem>>, vector<1x128xf32>
    %47 = vector.broadcast %46 : vector<1x128xf32> to vector<8x128xf32>
    %48 = arith.addf %45, %47 : vector<8x128xf32>
    %49 = arith.negf %48 : vector<8x128xf32>
    %50 = math.exp %49 : vector<8x128xf32>
    %cst_22 = arith.constant 1.000000e+00 : f32
    %51 = vector.broadcast %cst_22 : f32 to vector<8x128xf32>
    %52 = arith.addf %51, %50 : vector<8x128xf32>
    %53 = arith.divf %51, %52 : vector<8x128xf32>
    %54 = math.tanh %48 : vector<8x128xf32>
    %55 = vector.extract_strided_slice %53 {offsets = [0, 0], sizes = [8, 32], strides = [1, 1]} : vector<8x128xf32> to vector<8x32xf32>
    %56 = vector.extract_strided_slice %54 {offsets = [0, 32], sizes = [8, 32], strides = [1, 1]} : vector<8x128xf32> to vector<8x32xf32>
    %57 = vector.extract_strided_slice %53 {offsets = [0, 64], sizes = [8, 32], strides = [1, 1]} : vector<8x128xf32> to vector<8x32xf32>
    %58 = arith.mulf %55, %56 : vector<8x32xf32>
    %59 = math.tanh %58 : vector<8x32xf32>
    %60 = arith.mulf %57, %59 : vector<8x32xf32>
    %61 = arith.truncf %60 : vector<8x32xf32> to vector<8x32xbf16>
    %c144 = arith.constant 144 : index
    %c0_23 = arith.constant 0 : index
    %62 = vector.load %arg2[%c144, %c0_23] : memref<208x128xbf16, #tpu.memory_space<vmem>>, vector<32x128xbf16>
    %cst_24 = arith.constant dense<0.000000e+00> : vector<8x128xf32>
    %63 = tpu.matmul %61, %62, %cst_24 {dimension_numbers = #tpu.dot_dimension_numbers<[1], [0], [0], [1], [0, 0, 1, 1], [], []>} : vector<8x32xbf16>, vector<32x128xbf16>, vector<8x128xf32> -> vector<8x128xf32>
    %c4 = arith.constant 4 : index
    %c0_25 = arith.constant 0 : index
    %64 = vector.load %arg3[%c4, %c0_25] : memref<8x128xf32, #tpu.memory_space<vmem>>, vector<1x128xf32>
    %65 = vector.broadcast %64 : vector<1x128xf32> to vector<8x128xf32>
    %66 = arith.addf %63, %65 : vector<8x128xf32>
    %67 = arith.negf %66 : vector<8x128xf32>
    %68 = math.exp %67 : vector<8x128xf32>
    %cst_26 = arith.constant 1.000000e+00 : f32
    %69 = vector.broadcast %cst_26 : f32 to vector<8x128xf32>
    %70 = arith.addf %69, %68 : vector<8x128xf32>
    %71 = arith.divf %69, %70 : vector<8x128xf32>
    %72 = math.tanh %66 : vector<8x128xf32>
    %73 = vector.extract_strided_slice %71 {offsets = [0, 0], sizes = [8, 32], strides = [1, 1]} : vector<8x128xf32> to vector<8x32xf32>
    %74 = vector.extract_strided_slice %72 {offsets = [0, 32], sizes = [8, 32], strides = [1, 1]} : vector<8x128xf32> to vector<8x32xf32>
    %75 = vector.extract_strided_slice %71 {offsets = [0, 64], sizes = [8, 32], strides = [1, 1]} : vector<8x128xf32> to vector<8x32xf32>
    %76 = arith.mulf %73, %74 : vector<8x32xf32>
    %77 = math.tanh %76 : vector<8x32xf32>
    %78 = arith.mulf %75, %77 : vector<8x32xf32>
    %79 = arith.truncf %78 : vector<8x32xf32> to vector<8x32xbf16>
    %c176 = arith.constant 176 : index
    %c0_27 = arith.constant 0 : index
    %80 = vector.load %arg2[%c176, %c0_27] : memref<208x128xbf16, #tpu.memory_space<vmem>>, vector<32x128xbf16>
    %cst_28 = arith.constant dense<0.000000e+00> : vector<8x128xf32>
    %81 = tpu.matmul %79, %80, %cst_28 {dimension_numbers = #tpu.dot_dimension_numbers<[1], [0], [0], [1], [0, 0, 1, 1], [], []>} : vector<8x32xbf16>, vector<32x128xbf16>, vector<8x128xf32> -> vector<8x128xf32>
    %c5 = arith.constant 5 : index
    %c0_29 = arith.constant 0 : index
    %82 = vector.load %arg3[%c5, %c0_29] : memref<8x128xf32, #tpu.memory_space<vmem>>, vector<1x128xf32>
    %83 = vector.broadcast %82 : vector<1x128xf32> to vector<8x128xf32>
    %84 = arith.addf %81, %83 : vector<8x128xf32>
    %85 = tpu.iota {dimensions = array<i32: 1>} : vector<8x128xi32>
    %c42_i32 = arith.constant 42 : i32
    %86 = vector.broadcast %c42_i32 : i32 to vector<8x128xi32>
    %87 = arith.cmpi eq, %85, %86 : vector<8x128xi32>
    %88 = arith.negf %84 : vector<8x128xf32>
    %89 = math.exp %88 : vector<8x128xf32>
    %cst_30 = arith.constant 1.000000e+00 : f32
    %90 = vector.broadcast %cst_30 : f32 to vector<8x128xf32>
    %91 = arith.addf %90, %89 : vector<8x128xf32>
    %92 = arith.divf %90, %91 : vector<8x128xf32>
    %93 = arith.select %87, %92, %84 : vector<8x128xi1>, vector<8x128xf32>
    %cst_31 = arith.constant 0.000000e+00 : f32
    %94 = vector.broadcast %cst_31 : f32 to vector<8x96xf32>
    %95 = tpu.concatenate %78, %94 in 1 : vector<8x32xf32>, vector<8x96xf32> -> vector<8x128xf32>
    %96 = arith.addf %93, %95 : vector<8x128xf32>
    %c0_32 = arith.constant 0 : index
    %c0_33 = arith.constant 0 : index
    %97 = vector.load %arg4[%c0_32, %c0_33] : memref<8x128xf32, #tpu.memory_space<vmem>>, vector<8x128xf32>
    tpu.vector_store %arg4[%c0_32, %c0_33], %96 {strides = array<i32>} : memref<8x128xf32, #tpu.memory_space<vmem>>, vector<8x128xf32>,
    return
  }
  func.func @transform_0(%arg0: i32) -> (i32, i32) {
    %c0_i32 = arith.constant 0 : i32
    %c0_i32_0 = arith.constant 0 : i32
    return %arg0, %c0_i32 : i32, i32
  }
  func.func @transform_1(%arg0: i32) -> (i32, i32) {
    %c0_i32 = arith.constant 0 : i32
    %c0_i32_0 = arith.constant 0 : i32
    %c0_i32_1 = arith.constant 0 : i32
    return %c0_i32, %c0_i32_0 : i32, i32
  }
  func.func @transform_2(%arg0: i32) -> (i32, i32) {
    %c0_i32 = arith.constant 0 : i32
    %c0_i32_0 = arith.constant 0 : i32
    %c0_i32_1 = arith.constant 0 : i32
    return %c0_i32, %c0_i32_0 : i32, i32
  }
  func.func @transform_3(%arg0: i32) -> (i32, i32) {
    %c0_i32 = arith.constant 0 : i32
    %c0_i32_0 = arith.constant 0 : i32
    return %arg0, %c0_i32 : i32, i32
  }
}

</mosaic_0001>

<bundles_post_ra>
// kernel: tpu_custom_call.1
= control target key start
LH: loop header
LB: loop body
LE: loop exit
PB: predicated region body
PF: predicated region fallthrough
CT: control target
= control target key end

     0   :  { %8 = vsyncpa [#allocation3], 0  ;;  %s1223_s0 = inlined_call_operand.hbm [shape: f32[16,64], index: 0, kind: input, shape index: {}]   ;;  %s1224_s1 = inlined_call_operand.hbm [shape: bf16[208,128], index: 1, kind: input, shape index: {}]   ;;  %s1225_s2 = inlined_call_operand.hbm [shape: f32[8,128], index: 2, kind: input, shape index: {}]   ;;  %s1226_s3 = inlined_call_operand.hbm [shape: f32[16,128], index: 3, kind: output, shape index: {}]  }
   0x1   :  { %10 = vsyncpa [#allocation3 + $0x1], 0 }
   0x2   :  { %11 = vsyncpa [#allocation6], 0 }
   0x3   :  { %12 = vsyncpa [#allocation4], 0 }
   0x4   :  { %14 = vsyncpa [#allocation4 + $0x1], 0  ;;  %s1060_s12 = smov 0   ;;  %s1062_s13 = smov 0  }
   0x5   :  { %s1064_s14 = smov 0   ;;  %s1066_s15 = smov 0  }
   0x6 LB: > { %s130_s18 = sshll.u32 %s1224_s1, 4  ;;  %s1084_s19 = sadd.s32 4294967295, %s1031_s15   ;;  %s1031_s15 = sphi %s1066_s15, %s1237_s15   ;;  %s1027_s14 = sphi %s1064_s14, %s1236_s14   ;;  %s1023_s13 = sphi %s1062_s13, %s1235_s13   ;;  %s1019_s12 = sphi %s1060_s12, %s1234_s12   ;;  %s131_s18 = int_to_ptr.hbm [resolvable:$true] %s130_s18 }
   0x7   : > { %p680_p0 = scmp.ge.s32.totalorder %s1031_s15, 1  ;;  %p41_p1 = scmp.eq.s32.totalorder %s1084_s19, 0 }
   0x8   : > { %p119_p2 = scmp.lt.s32.totalorder %s1031_s15, 3  ;;  %s1033_s21 = smov [#allocation5]  }
   0x9   : > { %s132_s22 = sshll.u32 %s1033_s21, 4  ;;  %s145_s25 = sshll.u32 %s1225_s2, 4  ;;  %s133_s22 = int_to_ptr.vmem [resolvable:$true] %s132_s22  ;;  %s146_s25 = int_to_ptr.hbm [resolvable:$true] %s145_s25 }
   0xa   : > { %p1089_p3 = pnand %p680_p0, %p119_p2  ;;  %s1034_s26 = smov [#allocation7]  }
   0xb   : > { %s147_s27 = sshll.u32 %s1034_s26, 4  ;;  %s1035_s28 = smov 64   ;;  %s148_s27 = int_to_ptr.vmem [resolvable:$true] %s147_s27 }
   0xc   : > { %p781_p4 = pneg %p1089_p3  ;;  %s1036_s29 = smov 4  }
   0xd   : > { %s679_s30 = sadd.s32 4294967294, %s1031_s15   ;;  %s1103_s4 = sadd.s32 1, %s1031_s15  }
   0xe   : > { %p782_p6 = pnand %p781_p4, %p41_p1  ;;  %s24_s5 = ssub.s32 %s1031_s15, %s1103_s4 }
   0xf   : > { %s27_s6 = sadd.s32 1, %s1027_s14  ;;  %p25_p7 = scmp.eq.s32.totalorder %s24_s5, 0 }
  0x10   : > { %784 = dma.hbm_to_vmem [thread:$0]  (!%p782_p6), %s131_s18, 1664, %s133_s22, [#allocation6], %s1035_s28, %s1035_s28, %s1036_s29  }
  0x11   : > { %787 = dma.hbm_to_vmem [thread:$0]  (!%p782_p6), %s146_s25, 128, %s148_s27, [#allocation6]  }
  0x12   : > { %p34_p8 = scmp.ne.s32.totalorder %s1027_s14, %s1023_s13  ;;  %p35_p9 = scmp.eq.s32.totalorder %s1031_s15, 0 }
  0x13   : > { %p40_p10 = scmp.ne.s32.totalorder %s1023_s13, %s1019_s12  ;;  %p106_p13 = scmp.eq.s32.totalorder %s1084_s19, 1 }
  0x14   : > { %s1114_s7 = scalar_select %p25_p7, %s1027_s14, %s27_s6  }
  0x15   : > { %p1116_p11 = por %p35_p9, %p34_p8  ;;  %p1122_p12 = por %p41_p1, %p40_p10 }
  0x16   : > { %p112_p0 = scmp.eq.s32.totalorder %s679_s30, 1  ;;  %p798_p2 = scmp.lt.s32.totalorder %s1031_s15, 2 }
  0x17   : > { %s158_s10 = sand.u32 1, %s1027_s14   ;;  %p1129_p4 = por %p106_p13, %p34_p8 }
  0x18   : > { %p1133_p6 = por %p112_p0, %p40_p10  ;;  %s684_s17 = sshll.u32 %s158_s10, 3 }
  0x19   : > { %s685_s18 = sshll.u32 %s1031_s15, 3  ;;  %s162_s24 = scalar_lea.vmem [#allocation2], %s684_s17 }
  0x1a   : > { %s166_s23 = scalar_lea.hbm %s1223_s0, %s685_s18  ;;  %s170_s25 = sshll.u32 %s162_s24, 4  ;;  %s171_s25 = int_to_ptr.vmem [resolvable:$true] %s170_s25 }
  0x1b   : > { %s168_s26 = sshll.u32 %s166_s23, 4  ;;  %p1143_p7 = pnand %p798_p2, %p1116_p11  ;;  %s169_s26 = int_to_ptr.hbm [resolvable:$true] %s168_s26 }
  0x1c   : > { %s159_s28 = scalar_lea.sflag [#allocation3], %s158_s10  ;;  %s931_s29 = sshra.s32 %s169_s26, 4  ;;  %s932_s29 = int_to_ptr.hbm [resolvable:$true] %s931_s29 }
  0x1d   : > { %s933_s30 = scalar_lea.hbm %s932_s29, 8  ;;  %p935_p9 = pneg %p1143_p7 }
  0x1e   : > { %p934_p8 = scmp.ne.s32.totalorder %s932_s29, %s933_s30  ;;  %s938_s17 = scalar_lea.hbm %s1223_s0, 16 }
  0x1f   : > { %p939_p11 = scmp.lt.s32.totalorder %s932_s29, %s1223_s0  ;;  %p940_p0 = scmp.lt.s32.totalorder %s938_s17, %s933_s30 }
  0x20   : > { %p936_p10 = pnand %p935_p9, %p934_p8 }
  0x21   : > { %p941_p2 = por %p940_p0, %p939_p11 }
  0x22   : > { %p937_p13 = pneg %p936_p10 }
  0x24   : > { %p942_p5 = pnand %p941_p2, %p937_p13 }
  0x26   : > { %945 = shalt.err (!%p942_p5)
}
  0x27   : > { %791 = dma.hbm_to_vmem [thread:$0]  (!%p1143_p7), %s169_s26, 128, %s171_s25, %s159_s28  }
  0x28   : > { %179 = sbr.rel (%p1089_p3) target bundleno = 1729 (0x6c1), region = 32  ;;  %s1160_s10 = sand.u32 (!%p1089_p3), 1, %s1023_s13  }
  0x29   : > { %s687_s21 = sshll.u32 (!%p1089_p3), %s1160_s10, 3  ;;  %s182_s22 = scalar_lea.sflag (!%p1089_p3), [#allocation3], %s1160_s10 }
  0x2a   : > { %s185_s23 = scalar_lea.vmem (!%p1089_p3), [#allocation2], %s687_s21 }
  0x2d   : > { %1006 = dma.done.wait (%p1122_p12), %s182_s22, 128  }
  0x2e   : > { %1008 = vsyncadd (%p1122_p12), %s182_s22, 4294967168 }
  0x2f   : > { %1010 = dma.done.wait (%p41_p1), [#allocation6], 1792  }
  0x30   : > { %1012 = vsyncadd (%p41_p1), [#allocation6], 4294965504  ;;  %v759_v0 = vld [vmem:[#allocation5 + $0x18] sm:$0xff]  ;;  %v758_v1 = vld [vmem:[#allocation5 + $0x10] sm:$0xff]  ;;  %vm256_vm0 = vcmask 523264   ;;  %vm293_vm1 = vcmask 261120  }
  0x31   : > { %264 = vmatpush.bf16.msra.mxu0 %v759_v0  ;;  %v757_v2 = vld [vmem:[#allocation5 + $0x8] sm:$0xff]  ;;  %v756_v3 = vld [vmem:[#allocation5] sm:$0xff]  ;;  %v220_v4 = vld [vmem:[%s185_s23] sm:$0xff]  ;;  %v1037_v22 = vmov 32.0   ;;  %vm389_vm6 = vcmask 130048   ;;  %s1038_s20 = smov 96  }
  0x32   : > { %v221_v5 = vpack.c.bf16 %v220_v4, %v220_v4  ;;  %v761_v6 = vld [vmem:[#allocation5 + $0x28] sm:$0xff]  ;;  %v760_v7 = vld [vmem:[#allocation5 + $0x20] sm:$0xff]  ;;  %847 = vrcp.f32 %v1037_v22  ;;  %v763_v27 = vld [vmem:[#allocation5 + $0x38] sm:$0xff]  ;;  %s1039_s9 = smov 64   ;;  %s753_s24 = sshll.u32 %s1084_s19, 3 }
  0x33   : > { %303 = vmatpush.bf16.msra.mxu1 %v761_v6  ;;  %v841_v8 = vld [vmem:[#allocation7] ss:$0 sm:$0xff]  ;;  %v842_v14 = vld [vmem:[#allocation7 + $0x1] ss:$0 sm:$0xff]  ;;  %370 = vmatpush.bf16.msra.mxu2 %v763_v27  ;;  %v762_v29 = vld [vmem:[#allocation5 + $0x30] sm:$0xff]  ;;  %s585_s27 = scalar_lea.hbm %s1226_s3, %s753_s24  ;;  %s218_s19 = scalar_lea.vmem [#allocation8], %s687_s21 }
  0x34   : > { %v764_v48 = vld [vmem:[#allocation5 + $0x40] sm:$0xff]  ;;  %v843_v49 = vld [vmem:[#allocation7 + $0x2] ss:$0 sm:$0xff]  ;;  %v844_v55 = vld [vmem:[#allocation7 + $0x3] ss:$0 sm:$0xff]  ;;  %s587_s28 = sshll.u32 %s218_s19, 4  ;;  %s588_s28 = int_to_ptr.vmem [resolvable:$true] %s587_s28 }
  0x35   : > { %265 = vmatpush.bf16.msra.mxu0 %v758_v1  ;;  %400 = vmatpush.bf16.msra.mxu3 %v764_v48  ;;  %s589_s29 = sshll.u32 %s585_s27, 4  ;;  %s575_s30 = scalar_lea.sflag [#allocation4], %s1160_s10  ;;  %s590_s29 = int_to_ptr.hbm [resolvable:$true] %s589_s29 }
  0x36   : > { %s975_s5 = sshra.s32 %s590_s29, 4  ;;  %s981_s8 = scalar_lea.hbm %s1226_s3, 16  ;;  %s976_s5 = int_to_ptr.hbm [resolvable:$true] %s975_s5 }
  0x37   : > { %304 = vmatpush.bf16.msra.mxu1 %v760_v7  ;;  %371 = vmatpush.bf16.msra.mxu2 %v762_v29  ;;  %s977_s6 = scalar_lea.hbm %s976_s5, 8  ;;  %p982_p12 = scmp.lt.s32.totalorder %s976_s5, %s1226_s3 }
  0x38   : > { %v848_v23 = vpop.eup %847  ;;  %p978_p1 = scmp.ne.s32.totalorder %s976_s5, %s977_s6  ;;  %p983_p7 = scmp.lt.s32.totalorder %s981_s8, %s977_s6 }
  0x39   : > { %266 = vmatpush.bf16.msra.mxu0 %v757_v2  ;;  %v315_v24 = vmul.f32 32.0, %v848_v23  ;;  %vm319_vm2 = vweird.f32 %v848_v23 }
  0x3a   : > { %p979_p3 = pnand %p978_p1, %p1129_p4  ;;  %p984_p8 = por %p983_p7, %p982_p12 }
  0x3b   : > { %v316_v25 = vsub.f32 1.0, %v315_v24 }
  0x3c   : > { %p980_p5 = pneg %p979_p3 }
  0x3d   : > { %267 = vmatpush.bf16.msra.mxu0 %v756_v3  ;;  %v317_v26 = vmul.f32 %v848_v23, %v316_v25 }
  0x3e   : > { %p985_p9 = pnand %p984_p8, %p980_p5 }
  0x3f   : > { %v318_v28 = vadd.f32 %v848_v23, %v317_v26 }
  0x40   : > { %707 = vmatmul.msk.bf16.vlgmr.msra.gmra.mxu0 %vm256_vm0, %v221_v5 }
  0x41   : > { %v320_v31 = vsel %vm319_vm2, %v848_v23, %v318_v28 }
  0xbd   : > { %v269_v9 = vpop.f32.mrf.mxu0 }
  0xbe   : > { %v270_v10 = vadd.f32 %v841_v8, %v269_v9 }
  0xc0   : > { %v273_v11 = vmax.f32 %v270_v10, 0.0 }
  0xc2   : > { %v274_v12 = vpack.c.bf16 %v273_v11, %v273_v11 }
  0xc4   : > { %716 = vmatmul.msk.bf16.vlgmr.msra.gmra.mxu1 %vm293_vm1, %v274_v12  ;;  %v766_v12 = vld [vmem:[#allocation5 + $0x50] sm:$0xff] }
  0xc5   : > { %v271_v13 = vpop.f32.mrf.mxu0  ;;  %468 = vmatpush.bf16.msrb.mxu3 %v766_v12 }
  0xc6   : > { %v765_v13 = vld [vmem:[#allocation5 + $0x48] sm:$0xff] }
  0xc9   : > { %469 = vmatpush.bf16.msrb.mxu3 %v765_v13 }
 0x141   : > { %v306_v15 = vpop.f32.mrf.mxu1 }
 0x142   : > { %v307_v16 = vadd.f32 %v842_v14, %v306_v15 }
 0x144   : > { %v310_v17 = vmax.f32 %v307_v16, 0.0 }
 0x146   : > { %v311_v18 = vsel %vm293_vm1, %v310_v17, 0.0  ;;  %v322_v20 = vmul.f32 %v310_v17, %v310_v17 }
 0x147   : > { %312 = vadd.xlane.f32.xlu0 %v311_v18  ;;  %v845_v18 = vld [vmem:[#allocation7 + $0x4] ss:$0 sm:$0xff] }
 0x148   : > { %v323_v21 = vsel %vm293_vm1, %v322_v20, 0.0 }
 0x149   : > { %v308_v19 = vpop.f32.mrf.mxu1 }
 0x14f   : > { %324 = vadd.xlane.f32.xlu0 %v323_v21 }
 0x1ba   : > { %v313_v30 = vpop.xlane.xlu0 %312 }
 0x1bb   : > { %v321_v32 = vmul.f32 %v320_v31, %v313_v30 }
 0x1bd   : > { %v328_v34 = vmul.f32 %v321_v32, %v321_v32  ;;  %v327_v44 = vsub.f32 %v310_v17, %v321_v32 }
 0x1c2   : > { %v325_v33 = vpop.xlane.xlu0 %324 }
 0x1c3   : > { %v326_v35 = vmul.f32 %v325_v33, %v320_v31 }
 0x1c5   : > { %v329_v36 = vsub.f32 %v326_v35, %v328_v34 }
 0x1c7   : > { %v330_v37 = vadd.f32 1e-05, %v329_v36 }
 0x1c9   : > { %849 = vrsqrt.f32 %v330_v37  ;;  %vm337_vm4 = vweird.f32 %v330_v37 }
 0x1cf   : > { %v850_v38 = vpop.eup %849 }
 0x1d0   : > { %v332_v39 = vmul.f32 %v850_v38, %v330_v37  ;;  %vm338_vm3 = vweird.f32 %v850_v38 }
 0x1d1   : > { %vm339_vm5 = vmor %vm337_vm4, %vm338_vm3 }
 0x1d2   : > { %v333_v40 = vmul.f32 %v850_v38, %v332_v39 }
 0x1d4   : > { %v334_v41 = vmul.f32 0.5, %v333_v40 }
 0x1d6   : > { %v335_v42 = vsub.f32 1.5, %v334_v41 }
 0x1d8   : > { %v336_v43 = vmul.f32 %v850_v38, %v335_v42  ;;  %v768_v42 = vld [vmem:[#allocation5 + $0x60] sm:$0xff] }
 0x1d9   : > { %537 = vmatpush.bf16.msrb.mxu1 %v768_v42 }
 0x1da   : > { %v340_v45 = vsel %vm339_vm5, %v850_v38, %v336_v43  ;;  %v767_v43 = vld [vmem:[#allocation5 + $0x58] sm:$0xff] }
 0x1db   : > { %v341_v46 = vmul.f32 %v340_v45, %v327_v44  ;;  %v846_v45 = vld [vmem:[#allocation7 + $0x5] ss:$0 sm:$0xff] }
 0x1dd   : > { %v342_v47 = vpack.c.bf16 %v341_v46, %v341_v46  ;;  %538 = vmatpush.bf16.msrb.mxu1 %v767_v43 }
 0x1df   : > { %725 = vmatmul.msk.bf16.vlgmr.msra.gmra.mxu2 %vm293_vm1, %v342_v47 }
 0x262   : > { %v373_v50 = vpop.f32.mrf.mxu2 }
 0x263   : > { %v374_v51 = vadd.f32 %v843_v49, %v373_v50 }
 0x265   : > { %v377_v52 = vmax.f32 %v374_v51, 0.0 }
 0x267   : > { %v378_v53 = vpack.c.bf16 %v377_v52, %v377_v52 }
 0x269   : > { %730 = vmatmul.msk.bf16.vlgmr.msra.gmra.mxu3 %vm389_vm6, %v378_v53  ;;  %v544_v53 = vlaneseq }
 0x26a   : > { %v375_v54 = vpop.f32.mrf.mxu2 }
 0x2ec   : > { %v402_v56 = vpop.f32.mrf.mxu3 }
 0x2ed   : > { %v403_v57 = vadd.f32 %v844_v55, %v402_v56  ;;  %v545_v56 = vand.u32 127, %v544_v53 }
 0x2ef   : > { %851 = vtanh.f32 %v403_v57  ;;  %v731_v60 = vmul.f32 -1.442695, %v403_v57  ;;  %vm546_vm2 = vcmp.eq.s32.totalorder %v545_v56, 42 }
 0x2f1   : > { %853 = vpow2.f32 %v731_v60 }
 0x2f4   : > { %v404_v58 = vpop.f32.mrf.mxu3 }
 0x2f5   : > { %v852_v59 = vpop.eup %851 }
 0x2f6   : > { %427 = vrot.lane.b32.xlu1 %v852_v59, %s1038_s20 }
 0x2f7   : > { %v854_v61 = vpop.eup %853 }
 0x2f8   : > { %v409_v62 = vadd.f32 1.0, %v854_v61 }
 0x2fa   : > { %855 = vrcp.f32 %v409_v62  ;;  %v421_v4 = vand.u32 2147483648, %v409_v62  ;;  %vm415_vm8 = vweird.f32 %v409_v62  ;;  %v419_v5 = vand.u32 2147483647, %v409_v62 }
 0x2fc   : > { %v422_v7 = vor.u32 1.1754944e-38, %v421_v4  ;;  %vm420_vm10 = vcmp.eq.f32.partialorder %v419_v5, 8.507059e+37 }
 0x300   : > { %v856_v63 = vpop.eup %855 }
 0x301   : > { %v411_v0 = vmul.f32 %v856_v63, %v409_v62  ;;  %vm416_vm7 = vweird.f32 %v856_v63 }
 0x302   : > { %vm417_vm9 = vmor %vm415_vm8, %vm416_vm7 }
 0x303   : > { %v412_v1 = vsub.f32 1.0, %v411_v0 }
 0x305   : > { %v413_v2 = vmul.f32 %v856_v63, %v412_v1 }
 0x307   : > { %v414_v3 = vadd.f32 %v856_v63, %v413_v2 }
 0x309   : > { %v418_v6 = vsel %vm417_vm9, %v856_v63, %v414_v3 }
 0x30a   : > { %v423_v9 = vsel %vm420_vm10, %v422_v7, %v418_v6 }
 0x368   : > { %v428_v8 = vpop.permute.xlu1 %427 }
 0x369   : > { %v430_v10 = vmul.f32 %v428_v8, %v423_v9 }
 0x36b   : > { %857 = vtanh.f32 %v430_v10 }
 0x371   : > { %v858_v11 = vpop.eup %857 }
 0x372   : > { %433 = vrot.lane.b32.xlu1 %v858_v11, %s1039_s9 }
 0x3e4   : > { %v434_v14 = vpop.permute.xlu1 %433 }
 0x3e5   : > { %v436_v15 = vmul.f32 %v434_v14, %v423_v9 }
 0x3e7   : > { %v437_v16 = vpack.c.bf16 %v436_v15, %v436_v15 }
 0x3e9   : > { %445 = vrot.lane.b32.xlu2 %v437_v16, %s1039_s9 }
 0x443   : > { %v446_v17 = vpop.permute.xlu2 %445 }
 0x444   : > { %740 = vmatmul.msk.bf16.vlgmr.msrb.gmra.mxu3 %vm293_vm1, %v446_v17 }
 0x4c7   : > { %v471_v19 = vpop.f32.mrf.mxu3 }
 0x4c8   : > { %v472_v20 = vadd.f32 %v845_v18, %v471_v19 }
 0x4ca   : > { %859 = vtanh.f32 %v472_v20  ;;  %v741_v23 = vmul.f32 -1.442695, %v472_v20 }
 0x4cc   : > { %861 = vpow2.f32 %v741_v23 }
 0x4cf   : > { %v473_v21 = vpop.f32.mrf.mxu3 }
 0x4d0   : > { %v860_v22 = vpop.eup %859 }
 0x4d1   : > { %496 = vrot.lane.b32.xlu2 %v860_v22, %s1038_s20 }
 0x4d2   : > { %v862_v24 = vpop.eup %861 }
 0x4d3   : > { %v478_v25 = vadd.f32 1.0, %v862_v24 }
 0x4d5   : > { %863 = vrcp.f32 %v478_v25  ;;  %v490_v31 = vand.u32 2147483648, %v478_v25  ;;  %vm484_vm12 = vweird.f32 %v478_v25  ;;  %v488_v32 = vand.u32 2147483647, %v478_v25 }
 0x4d7   : > { %v491_v34 = vor.u32 1.1754944e-38, %v490_v31  ;;  %vm489_vm14 = vcmp.eq.f32.partialorder %v488_v32, 8.507059e+37 }
 0x4db   : > { %v864_v26 = vpop.eup %863 }
 0x4dc   : > { %v480_v27 = vmul.f32 %v864_v26, %v478_v25  ;;  %vm485_vm11 = vweird.f32 %v864_v26 }
 0x4dd   : > { %vm486_vm13 = vmor %vm484_vm12, %vm485_vm11 }
 0x4de   : > { %v481_v28 = vsub.f32 1.0, %v480_v27 }
 0x4e0   : > { %v482_v29 = vmul.f32 %v864_v26, %v481_v28 }
 0x4e2   : > { %v483_v30 = vadd.f32 %v864_v26, %v482_v29 }
 0x4e4   : > { %v487_v33 = vsel %vm486_vm13, %v864_v26, %v483_v30 }
 0x4e5   : > { %v492_v36 = vsel %vm489_vm14, %v491_v34, %v487_v33 }
 0x52b   : > { %v497_v35 = vpop.permute.xlu2 %496 }
 0x52c   : > { %v499_v37 = vmul.f32 %v497_v35, %v492_v36 }
 0x52e   : > { %865 = vtanh.f32 %v499_v37 }
 0x534   : > { %v866_v38 = vpop.eup %865 }
 0x535   : > { %502 = vrot.lane.b32.xlu0 %v866_v38, %s1039_s9 }
 0x5a7   : > { %v503_v39 = vpop.permute.xlu0 %502 }
 0x5a8   : > { %v505_v40 = vmul.f32 %v503_v39, %v492_v36 }
 0x5aa   : > { %v506_v41 = vpack.c.bf16 %v505_v40, %v505_v40  ;;  %568 = vrot.lane.b32.xlu2 %v505_v40, %s1039_s9 }
 0x5ac   : > { %514 = vrot.lane.b32.xlu1 %v506_v41, %s1039_s9 }
 0x604   : > { %v569_v61 = vpop.permute.xlu2 %568 }
 0x605   : > { %v571_v1 = vsel %vm293_vm1, %v569_v61, 0.0 }
 0x61e   : > { %v515_v44 = vpop.permute.xlu1 %514 }
 0x61f   : > { %750 = vmatmul.msk.bf16.vlgmr.msrb.gmra.mxu1 %vm293_vm1, %v515_v44 }
 0x69c   : > { %v540_v46 = vpop.f32.mrf.mxu1 }
 0x69d   : > { %v541_v47 = vadd.f32 %v846_v45, %v540_v46 }
 0x69f   : > { %v751_v48 = vmul.f32 -1.442695, %v541_v47 }
 0x6a1   : > { %867 = vpow2.f32 %v751_v48 }
 0x6a4   : > { %v542_v49 = vpop.f32.mrf.mxu1 }
 0x6a7   : > { %v868_v50 = vpop.eup %867 }
 0x6a8   : > { %v550_v51 = vadd.f32 1.0, %v868_v50 }
 0x6aa   : > { %869 = vrcp.f32 %v550_v51  ;;  %v562_v57 = vand.u32 2147483648, %v550_v51  ;;  %v560_v59 = vand.u32 2147483647, %v550_v51  ;;  %vm556_vm0 = vweird.f32 %v550_v51 }
 0x6ac   : > { %v563_v62 = vor.u32 1.1754944e-38, %v562_v57  ;;  %vm561_vm4 = vcmp.eq.f32.partialorder %v560_v59, 8.507059e+37 }
 0x6b0   : > { %v870_v52 = vpop.eup %869 }
 0x6b1   : > { %v552_v54 = vmul.f32 %v870_v52, %v550_v51  ;;  %vm557_vm15 = vweird.f32 %v870_v52 }
 0x6b2   : > { %vm558_vm3 = vmor %vm556_vm0, %vm557_vm15 }
 0x6b3   : > { %v553_v55 = vsub.f32 1.0, %v552_v54 }
 0x6b5   : > { %v554_v58 = vmul.f32 %v870_v52, %v553_v55 }
 0x6b7   : > { %v555_v60 = vadd.f32 %v870_v52, %v554_v58 }
 0x6b9   : > { %v559_v63 = vsel %vm558_vm3, %v870_v52, %v555_v60 }
 0x6ba   : > { %v564_v0 = vsel %vm561_vm4, %v563_v62, %v559_v63 }
 0x6bb   : > { %v566_v2 = vsel %vm546_vm2, %v564_v0, %v541_v47 }
 0x6bc   : > { %v572_v3 = vadd.f32 %v571_v1, %v566_v2 }
 0x6be   : > { %573 = vst [vmem:[%s218_s19] sm:$0xff] %v572_v3 }
 0x6bf   : > { %988 = shalt.err (!%p985_p9)
}
 0x6c0   : > { %779 = dma.vmem_to_hbm [thread:$0]  (%p1129_p4), %s588_s28, 128, %s590_s29, %s575_s30  }
 0x6c1 PF: > { %s601_s10 = sand.u32 1, %s1019_s12   ;;  %p1233_p10 = scmp.ge.s32.totalorder %s1031_s15, 2 }
 0x6c2   : > { %s602_s23 = scalar_lea.sflag [#allocation4], %s601_s10 }
 0x6c3   : > { %p793_p13 = pnand %p1233_p10, %p1133_p6 }
 0x6c5   : > { %p794_p11 = pneg %p793_p13 }
 0x6c7   : > { %1014 = dma.done.wait (%p794_p11), %s602_s23, 128  }
 0x6c8   : > { %1016 = vsyncadd (%p794_p11), %s602_s23, 4294967168  ;;  %p17_p0 = scmp.ge.s32.totalorder %s1103_s4, 4   ;;  %s1234_s12 = smov %s1023_s13 }
 0x6c9   : > { %s1235_s13 = smov %s1027_s14  ;;  %s1236_s14 = smov %s1114_s7 }
 0x6ca   : > { %s1237_s15 = smov %s1103_s4  ;;  %19 = sbr.rel (!%p17_p0) target bundleno = 6 (0x6), region = 85 }
 0x6cf   :  { %608 = vsyncpa [#allocation3], 1 }
 0x6d0   :  { %610 = vsyncpa [#allocation3 + $0x1], 1 }
 0x6d1   :  { %611 = vsyncpa [#allocation6], 1 }
 0x6d2   :  { %612 = vsyncpa [#allocation4], 1 }
 0x6d3   :  { %614 = vsyncpa [#allocation4 + $0x1], 1 }

</bundles_post_ra>
